<compile_context>
chip_gen: v5e
topology: v5e:2x2
jax: 0.10.0
libtpu: 0.0.40
codegen_flags: <defaults>
</compile_context>

<pallas_src>
import jax
import jax.numpy as jnp
from jax import lax
from jax.experimental import pallas as pl
from jax.experimental.pallas import tpu as pltpu


_COMPUTE_DTYPE = jnp.bfloat16   # MXU operand dtype (accumulation stays f32)


# ----------------------------------------------------------------------------
# In-register column shifts (XLU roll + VPU select): value of the left / right
# W-neighbour with the conv's zero padding at the borders.
# ----------------------------------------------------------------------------
def _col_prev(a, col_idx):
    """out[:, j, :] = a[:, j-1, :], zero at j == 0."""
    return jnp.where(col_idx == 0, 0.0, pltpu.roll(a, shift=1, axis=1))


def _col_next(a, col_idx):
    """out[:, j, :] = a[:, j+1, :], zero at j == W-1."""
    w = a.shape[1]
    rolled = pltpu.roll(a, shift=w - 1, axis=1)   # == shift by -1
    return jnp.where(col_idx == w - 1, 0.0, rolled)


# ----------------------------------------------------------------------------
# Fused bottleneck kernels (one per stride)
# ----------------------------------------------------------------------------
def _bottleneck_s1_kernel(x_ref, w1sc_ref, b1sc_ref, w2_ref, b2_ref,
                          w3_ref, b3_ref, o_ref, pad_ref):
    """stride=1 bottleneck: x_ref (1, H, W, Cin) bf16 -> o_ref (1, H, W, Cout)."""
    _, h, w, cin = x_ref.shape
    cout = w3_ref.shape[1]
    cm = w2_ref.shape[2]
    m = h * w
    f32 = jnp.float32
    cdt = pad_ref.dtype

    # conv1 (1x1 + folded BN + ReLU) fused with the 1x1 shortcut: one matmul
    # against [w_sc | w1] (lane-concatenated, shortcut slab first), then slice.
    x2d = x_ref[0].reshape(m, cin)
    t = jnp.dot(x2d, w1sc_ref[...], preferred_element_type=f32) + b1sc_ref[...]
    sc = t[:, :cout]                              # shortcut branch (no ReLU)
    t1 = jnp.maximum(t[:, cout:], 0.0)            # (m, cm) f32

    # dx-concatenated conv2 operand: channel slab dx holds the column
    # (j + dx - 1) neighbour of t1 (zeros at the W borders).  Shifts happen in
    # registers so the scratch stores below are full-width, offset-0 stores.
    t1_3 = t1.reshape(h, w, cm)
    col = lax.broadcasted_iota(jnp.int32, (h, w, cm), 1)
    b_mid = jnp.concatenate(
        [_col_prev(t1_3, col), t1_3, _col_next(t1_3, col)], axis=-1).astype(cdt)

    # 1-row halo buffer: only rows 0 and h+1 (the conv's zero padding) are
    # zeroed each step; the interior is fully overwritten.
    zrow = jnp.zeros((1, w, 3 * cm), cdt)
    pad_ref[0:1] = zrow
    pad_ref[h + 1:h + 2] = zrow
    pad_ref[1:h + 1] = b_mid

    # conv2 (3x3, pad 1, stride 1): three K=3*cm matmuls, one per dy.
    acc = jnp.dot(pad_ref[0:h].reshape(m, 3 * cm), w2_ref[0],
                  preferred_element_type=f32)                      # dy = 0
    acc = acc + jnp.dot(b_mid.reshape(m, 3 * cm), w2_ref[1],
                        preferred_element_type=f32)                # dy = 1
    acc = acc + jnp.dot(pad_ref[2:h + 2].reshape(m, 3 * cm), w2_ref[2],
                        preferred_element_type=f32)                # dy = 2
    t2 = jnp.maximum(acc + b2_ref[...], 0.0).astype(cdt)

    # conv3 (1x1, no ReLU) + residual add + final ReLU.
    y = jnp.dot(t2, w3_ref[...], preferred_element_type=f32) + b3_ref[...]
    out = jnp.maximum(y + sc, 0.0)
    o_ref[...] = out.reshape(1, h, w, cout).astype(o_ref.dtype)


def _bottleneck_s2_kernel(x_ref, w1sc_ref, b1sc_ref, w2_ref, b2_ref,
                          w3_ref, b3_ref, o_ref, odd_ref):
    """stride=2 bottleneck on a space-to-depth input.

    x_ref: (1, Ho, Wo, 4*Cin) bf16 where channel slab k = 2*py + px holds the
           stride-2 parity sub-image x[2i+py, 2j+px, :].
    o_ref: (1, Ho, Wo, Cout)
    """
    _, ho, wo, c4 = x_ref.shape
    cin = c4 // 4
    cout = w3_ref.shape[1]
    cm = w2_ref.shape[2]
    m = ho * wo
    f32 = jnp.float32
    cdt = odd_ref.dtype

    w1sc = w1sc_ref[...]
    b1sc = b1sc_ref[...]
    w1 = w1sc[:, cout:]
    b1 = b1sc[:, cout:]

    def parity(k):
        return x_ref[0, :, :, k * cin:(k + 1) * cin].reshape(m, cin)

    # even/even parity: conv1 fused with the strided 1x1 shortcut (which reads
    # exactly x[2i, 2j, :]).
    t = jnp.dot(parity(0), w1sc, preferred_element_type=f32) + b1sc
    sc = t[:, :cout]
    tee = jnp.maximum(t[:, cout:], 0.0).reshape(ho, wo, cm)

    def conv1(k):
        return jnp.maximum(
            jnp.dot(parity(k), w1, preferred_element_type=f32) + b1,
            0.0).reshape(ho, wo, cm)

    teo = conv1(1)   # rows 2i,   cols 2j+1
    toe = conv1(2)   # rows 2i+1, cols 2j
    too = conv1(3)   # rows 2i+1, cols 2j+1

    col = lax.broadcasted_iota(jnp.int32, (ho, wo, cm), 1)

    # K-concatenated conv2 operands (dx slab order matches w2's K layout):
    #   even rows (dy=1 taps):   [teo[i, j-1] | tee[i, j] | teo[i, j]]
    #   odd  rows (dy=0/2 taps): [too[i, j-1] | toe[i, j] | too[i, j]]
    even = jnp.concatenate([_col_prev(teo, col), tee, teo],
                           axis=-1).astype(cdt).reshape(m, 3 * cm)
    odd = jnp.concatenate([_col_prev(too, col), toe, too], axis=-1).astype(cdt)

    # The odd-row operand needs a 1-row halo (dy=0 at output row 0 reads the
    # conv's zero padding), so stage it in VMEM scratch; dy=0 and dy=2 then
    # read it at plain row offsets (aligned, no masked stores).
    odd_ref[0:1] = jnp.zeros((1, wo, 3 * cm), cdt)
    odd_ref[1:ho + 1] = odd

    # conv2 (3x3, pad 1, stride 2) computed only at strided output positions.
    acc = jnp.dot(odd_ref[0:ho].reshape(m, 3 * cm), w2_ref[0],
                  preferred_element_type=f32)                        # dy = 0
    acc = acc + jnp.dot(even, w2_ref[1], preferred_element_type=f32)  # dy = 1
    acc = acc + jnp.dot(odd_ref[1:ho + 1].reshape(m, 3 * cm), w2_ref[2],
                        preferred_element_type=f32)                   # dy = 2
    t2 = jnp.maximum(acc + b2_ref[...], 0.0).astype(cdt)

    # conv3 (no ReLU) + residual add + final ReLU.
    y = jnp.dot(t2, w3_ref[...], preferred_element_type=f32) + b3_ref[...]
    out = jnp.maximum(y + sc, 0.0)
    o_ref[...] = out.reshape(1, ho, wo, cout).astype(o_ref.dtype)


# ----------------------------------------------------------------------------
# Parameter preparation (call ONCE, outside the per-step jit)
# ----------------------------------------------------------------------------
def fold_params(p, compute_dtype=_COMPUTE_DTYPE):
    """Fold eval-mode BN into the convs (in f32), lane-concat the shortcut with
    conv1, fold conv2's dx taps into its K axis, and cast matmul operands to
    the MXU dtype. Doing this per forward call would re-stream every weight
    through HBM; do it once instead."""
    cm = p["w1"].shape[1]
    cout = p["w3"].shape[1]
    w1 = p["w1"] * p["s1"][None, :]
    w2 = p["w2"] * p["s2"][None, None, None, :]
    w3 = p["w3"] * p["s3"][None, :]
    wsc = p["w_sc"] * p["s_sc"][None, :]
    return {
        # shortcut slab first so both output slabs stay lane-aligned
        "w1sc": jnp.concatenate([wsc, w1], axis=1).astype(compute_dtype),
        "b1sc": jnp.concatenate([p["b_sc"], p["b1"]]).reshape(
            1, cout + cm).astype(jnp.float32),
        # (dy, dx, ci, co) -> (dy, dx*cm + ci, co): dx folded into K (outer)
        "w2": w2.reshape(3, 3 * cm, cm).astype(compute_dtype),
        "b2": p["b2"].reshape(1, cm).astype(jnp.float32),
        "w3": w3.astype(compute_dtype),
        "b3": p["b3"].reshape(1, cout).astype(jnp.float32),
    }


def _vmem_limit_bytes():
    # ~48 MiB on v7x (64 MiB physical), ~96 MiB on v5e/v6e (128 MiB physical).
    try:
        phys = pltpu.get_tpu_info().vmem_capacity_bytes
    except Exception:
        phys = 64 * 1024 * 1024
    return int(min(phys * 3 // 4, 100 * 1024 * 1024))


# ----------------------------------------------------------------------------
# Wrapper: NCHW in / NCHW out (PyTorch convention)
# ----------------------------------------------------------------------------
def bottleneck_forward(x_nchw, fp, strides):
    n, cin, h, w = x_nchw.shape
    cm = fp["w2"].shape[2]
    cout = fp["w3"].shape[1]
    out_dtype = x_nchw.dtype
    cdt = fp["w1sc"].dtype

    x_c = x_nchw.astype(cdt)   # bf16 activations over HBM / into the MXU

    if strides == 1:
        ho, wo = h, w
        # channels-last boundary transpose (lane dim = channels)
        x_in = jnp.transpose(x_c, (0, 2, 3, 1))
        x_block = (1, h, w, cin)
        kernel = _bottleneck_s1_kernel
        scratch = [pltpu.VMEM((h + 2, w, 3 * cm), cdt)]
    elif strides == 2:
        assert h % 2 == 0 and w % 2 == 0, "stride-2 path assumes even H, W"
        ho, wo = h // 2, w // 2
        # Reuse the mandatory channels-last boundary transpose as a
        # space-to-depth: (N,C,H,W) -> (N, Ho, Wo, [py, px, C]).
        x_in = jnp.transpose(
            x_c.reshape(n, cin, ho, 2, wo, 2),
            (0, 2, 4, 3, 5, 1)).reshape(n, ho, wo, 4 * cin)
        x_block = (1, ho, wo, 4 * cin)
        kernel = _bottleneck_s2_kernel
        scratch = [pltpu.VMEM((ho + 1, wo, 3 * cm), cdt)]
    else:
        raise NotImplementedError("strides must be 1 or 2")

    out = pl.pallas_call(
        kernel,
        out_shape=jax.ShapeDtypeStruct((n, ho, wo, cout), out_dtype),
        grid_spec=pltpu.PrefetchScalarGridSpec(
            num_scalar_prefetch=0,
            grid=(n,),
            in_specs=[
                pl.BlockSpec(x_block, lambda i: (i, 0, 0, 0)),
                pl.BlockSpec((cin, cout + cm), lambda i: (0, 0)),
                pl.BlockSpec((1, cout + cm), lambda i: (0, 0)),
                pl.BlockSpec((3, 3 * cm, cm), lambda i: (0, 0, 0)),
                pl.BlockSpec((1, cm), lambda i: (0, 0)),
                pl.BlockSpec((cm, cout), lambda i: (0, 0)),
                pl.BlockSpec((1, cout), lambda i: (0, 0)),
            ],
            out_specs=pl.BlockSpec((1, ho, wo, cout), lambda i: (i, 0, 0, 0)),
            scratch_shapes=scratch,
        ),
        compiler_params=pltpu.CompilerParams(
            dimension_semantics=("parallel",),   # batch across megacore TCs
            vmem_limit_bytes=_vmem_limit_bytes(),
        ),
    )(x_in, fp["w1sc"], fp["b1sc"], fp["w2"], fp["b2"], fp["w3"], fp["b3"])

    # channels-last -> NCHW at the block boundary.
    return jnp.transpose(out, (0, 3, 1, 2))


# ----------------------------------------------------------------------------
# Deterministic parameter init + pure-JAX reference (mimics kernel numerics)
# ----------------------------------------------------------------------------
def _make_bn(key, c):
    k1, k2, k3, k4 = jax.random.split(key, 4)
    gamma = 1.0 + 0.1 * jax.random.normal(k1, (c,), jnp.float32)
    beta = 0.1 * jax.random.normal(k2, (c,), jnp.float32)
    mean = 0.1 * jax.random.normal(k3, (c,), jnp.float32)
    var = 1.0 + 0.1 * jax.random.uniform(k4, (c,), jnp.float32)
    eps = 1e-5
    scale = gamma / jnp.sqrt(var + eps)
    bias = beta - mean * scale
    return scale, bias


def init_params(key, c_in, c_out):
    c_exp = 4 * c_out
    ks = jax.random.split(key, 8)
    p = {}
    p["w1"] = 0.2 * jax.random.normal(ks[0], (c_in, c_out), jnp.float32)
    p["w2"] = 0.2 * jax.random.normal(ks[1], (3, 3, c_out, c_out), jnp.float32)
    p["w3"] = 0.2 * jax.random.normal(ks[2], (c_out, c_exp), jnp.float32)
    p["w_sc"] = 0.2 * jax.random.normal(ks[3], (c_in, c_exp), jnp.float32)
    p["s1"], p["b1"] = _make_bn(ks[4], c_out)
    p["s2"], p["b2"] = _make_bn(ks[5], c_out)
    p["s3"], p["b3"] = _make_bn(ks[6], c_exp)
    p["s_sc"], p["b_sc"] = _make_bn(ks[7], c_exp)
    return p


def ref_forward(x_nchw, p, strides, compute_dtype=_COMPUTE_DTYPE):
    """lax.conv reference with the same BN folding and bf16 rounding points."""
    f32 = jnp.float32
    w1 = (p["w1"] * p["s1"][None, :]).astype(compute_dtype)
    w2 = (p["w2"] * p["s2"][None, None, None, :]).astype(compute_dtype)
    w3 = (p["w3"] * p["s3"][None, :]).astype(compute_dtype)
    wsc = (p["w_sc"] * p["s_sc"][None, :]).astype(compute_dtype)
    x = jnp.transpose(x_nchw, (0, 2, 3, 1)).astype(compute_dtype)

    def conv(xx, ww, stride, pad):
        return lax.conv_general_dilated(
            xx, ww, window_strides=(stride, stride), padding=pad,
            dimension_numbers=("NHWC", "HWIO", "NHWC"),
            preferred_element_type=f32)

    t1 = jnp.maximum(conv(x, w1[None, None], 1, [(0, 0), (0, 0)]) + p["b1"], 0.0)
    t2 = jnp.maximum(
        conv(t1.astype(compute_dtype), w2, strides, [(1, 1), (1, 1)]) + p["b2"],
        0.0)
    y = conv(t2.astype(compute_dtype), w3[None, None], 1, [(0, 0), (0, 0)]) + p["b3"]
    sc = conv(x, wsc[None, None], strides, [(0, 0), (0, 0)]) + p["b_sc"]
    out = jnp.maximum(y + sc, 0.0)
    return jnp.transpose(out, (0, 3, 1, 2)).astype(x_nchw.dtype)


if __name__ == "__main__":
    key = jax.random.PRNGKey(0)
    k_x, k_p = jax.random.split(key)

    N, C_IN, H, W = 2, 4, 16, 16   # input (NCHW)
    C_OUT = 4                      # bottleneck width; expansion -> 4*C_OUT

    x = jax.random.normal(k_x, (N, C_IN, H, W), jnp.float32)
    params = init_params(k_p, C_IN, C_OUT)
    fp = fold_params(params)       # BN fold / concat / bf16 cast done once

    fwd = jax.jit(bottleneck_forward, static_argnums=(2,))

    # stride-2 block (spatial downsampling + projection shortcut)
    y2 = jax.block_until_ready(fwd(x, fp, 2))
    assert y2.shape == (N, 4 * C_OUT, H // 2, W // 2), y2.shape
    y2_ref = ref_forward(x, params, 2)
    err2 = float(jnp.max(jnp.abs(y2 - y2_ref)))
    assert err2 < 5e-2, err2

    # stride-1 block
    y1 = jax.block_until_ready(fwd(x, fp, 1))
    assert y1.shape == (N, 4 * C_OUT, H, W), y1.shape
    y1_ref = ref_forward(x, params, 1)
    err1 = float(jnp.max(jnp.abs(y1 - y1_ref)))
    assert err1 < 5e-2, err1

    print("KERNEL_OK")
</pallas_src>

<mosaic_0001>
module attributes {stable_mosaic.version = 11 : i64} {
  func.func @_bottleneck_s2_kernel(%arg0: i32, %arg1: memref<1x8x8x16xbf16, #tpu.memory_space<vmem>>, %arg2: memref<4x20xbf16, #tpu.memory_space<vmem>>, %arg3: memref<1x20xf32, #tpu.memory_space<vmem>>, %arg4: memref<3x12x4xbf16, #tpu.memory_space<vmem>>, %arg5: memref<1x4xf32, #tpu.memory_space<vmem>>, %arg6: memref<4x16xbf16, #tpu.memory_space<vmem>>, %arg7: memref<1x16xf32, #tpu.memory_space<vmem>>, %arg8: memref<1x8x8x16xf32, #tpu.memory_space<vmem>>, %arg9: memref<9x8x12xbf16, #tpu.memory_space<vmem>>) attributes {dimension_semantics = [#tpu.dimension_semantics<parallel>], iteration_bounds = array<i64: 2>, scalar_prefetch = 0 : i64, scratch_operands = 1 : i64, tpu.core_type = #tpu.core_type<tc>, window_params = [{transform_indices = @transform_0, window_bounds = array<i64: 1, 8, 8, 16>}, {pipeline_mode = #tpu.pipeline_mode<synchronous>, transform_indices = @transform_1, window_bounds = array<i64: 4, 20>}, {pipeline_mode = #tpu.pipeline_mode<synchronous>, transform_indices = @transform_2, window_bounds = array<i64: 1, 20>}, {pipeline_mode = #tpu.pipeline_mode<synchronous>, transform_indices = @transform_3, window_bounds = array<i64: 3, 12, 4>}, {pipeline_mode = #tpu.pipeline_mode<synchronous>, transform_indices = @transform_4, window_bounds = array<i64: 1, 4>}, {pipeline_mode = #tpu.pipeline_mode<synchronous>, transform_indices = @transform_5, window_bounds = array<i64: 4, 16>}, {pipeline_mode = #tpu.pipeline_mode<synchronous>, transform_indices = @transform_6, window_bounds = array<i64: 1, 16>}, {transform_indices = @transform_7, window_bounds = array<i64: 1, 8, 8, 16>}]} {
    %c0 = arith.constant 0 : index
    %c0_0 = arith.constant 0 : index
    %0 = vector.load %arg2[%c0, %c0_0] : memref<4x20xbf16, #tpu.memory_space<vmem>>, vector<4x20xbf16>
    %c0_1 = arith.constant 0 : index
    %c0_2 = arith.constant 0 : index
    %1 = vector.load %arg3[%c0_1, %c0_2] : memref<1x20xf32, #tpu.memory_space<vmem>>, vector<1x20xf32>
    %2 = vector.extract_strided_slice %0 {offsets = [0, 16], sizes = [4, 4], strides = [1, 1]} : vector<4x20xbf16> to vector<4x4xbf16>
    %3 = vector.extract_strided_slice %1 {offsets = [0, 16], sizes = [1, 4], strides = [1, 1]} : vector<1x20xf32> to vector<1x4xf32>
    %c0_3 = arith.constant 0 : index
    %c0_4 = arith.constant 0 : index
    %c0_5 = arith.constant 0 : index
    %c0_6 = arith.constant 0 : index
    %4 = vector.load %arg1[%c0_3, %c0_4, %c0_5, %c0_6] : memref<1x8x8x16xbf16, #tpu.memory_space<vmem>>, vector<1x8x8x4xbf16>
    %5 = vector.shape_cast %4 : vector<1x8x8x4xbf16> to vector<8x8x4xbf16>
    %6 = vector.shape_cast %5 : vector<8x8x4xbf16> to vector<64x4xbf16>
    %cst = arith.constant dense<0.000000e+00> : vector<64x20xf32>
    %7 = tpu.matmul %6, %0, %cst {dimension_numbers = #tpu.dot_dimension_numbers<[1], [0], [0], [1], [0, 0, 1, 1], [], []>} : vector<64x4xbf16>, vector<4x20xbf16>, vector<64x20xf32> -> vector<64x20xf32>
    %8 = vector.broadcast %1 : vector<1x20xf32> to vector<64x20xf32>
    %9 = arith.addf %7, %8 : vector<64x20xf32>
    %10 = vector.extract_strided_slice %9 {offsets = [0, 0], sizes = [64, 16], strides = [1, 1]} : vector<64x20xf32> to vector<64x16xf32>
    %11 = vector.extract_strided_slice %9 {offsets = [0, 16], sizes = [64, 4], strides = [1, 1]} : vector<64x20xf32> to vector<64x4xf32>
    %cst_7 = arith.constant 0.000000e+00 : f32
    %12 = vector.broadcast %cst_7 : f32 to vector<64x4xf32>
    %13 = arith.maximumf %11, %12 : vector<64x4xf32>
    %14 = vector.shape_cast %13 : vector<64x4xf32> to vector<8x8x4xf32>
    %c0_8 = arith.constant 0 : index
    %c0_9 = arith.constant 0 : index
    %c0_10 = arith.constant 0 : index
    %c4 = arith.constant 4 : index
    %15 = vector.load %arg1[%c0_8, %c0_9, %c0_10, %c4] : memref<1x8x8x16xbf16, #tpu.memory_space<vmem>>, vector<1x8x8x4xbf16>
    %16 = vector.shape_cast %15 : vector<1x8x8x4xbf16> to vector<8x8x4xbf16>
    %17 = vector.shape_cast %16 : vector<8x8x4xbf16> to vector<64x4xbf16>
    %cst_11 = arith.constant dense<0.000000e+00> : vector<64x4xf32>
    %18 = tpu.matmul %17, %2, %cst_11 {dimension_numbers = #tpu.dot_dimension_numbers<[1], [0], [0], [1], [0, 0, 1, 1], [], []>} : vector<64x4xbf16>, vector<4x4xbf16>, vector<64x4xf32> -> vector<64x4xf32>
    %19 = vector.broadcast %3 : vector<1x4xf32> to vector<64x4xf32>
    %20 = arith.addf %18, %19 : vector<64x4xf32>
    %cst_12 = arith.constant 0.000000e+00 : f32
    %21 = vector.broadcast %cst_12 : f32 to vector<64x4xf32>
    %22 = arith.maximumf %20, %21 : vector<64x4xf32>
    %23 = vector.shape_cast %22 : vector<64x4xf32> to vector<8x8x4xf32>
    %c0_13 = arith.constant 0 : index
    %c0_14 = arith.constant 0 : index
    %c0_15 = arith.constant 0 : index
    %c8 = arith.constant 8 : index
    %24 = vector.load %arg1[%c0_13, %c0_14, %c0_15, %c8] : memref<1x8x8x16xbf16, #tpu.memory_space<vmem>>, vector<1x8x8x4xbf16>
    %25 = vector.shape_cast %24 : vector<1x8x8x4xbf16> to vector<8x8x4xbf16>
    %26 = vector.shape_cast %25 : vector<8x8x4xbf16> to vector<64x4xbf16>
    %cst_16 = arith.constant dense<0.000000e+00> : vector<64x4xf32>
    %27 = tpu.matmul %26, %2, %cst_16 {dimension_numbers = #tpu.dot_dimension_numbers<[1], [0], [0], [1], [0, 0, 1, 1], [], []>} : vector<64x4xbf16>, vector<4x4xbf16>, vector<64x4xf32> -> vector<64x4xf32>
    %28 = vector.broadcast %3 : vector<1x4xf32> to vector<64x4xf32>
    %29 = arith.addf %27, %28 : vector<64x4xf32>
    %cst_17 = arith.constant 0.000000e+00 : f32
    %30 = vector.broadcast %cst_17 : f32 to vector<64x4xf32>
    %31 = arith.maximumf %29, %30 : vector<64x4xf32>
    %32 = vector.shape_cast %31 : vector<64x4xf32> to vector<8x8x4xf32>
    %c0_18 = arith.constant 0 : index
    %c0_19 = arith.constant 0 : index
    %c0_20 = arith.constant 0 : index
    %c12 = arith.constant 12 : index
    %33 = vector.load %arg1[%c0_18, %c0_19, %c0_20, %c12] : memref<1x8x8x16xbf16, #tpu.memory_space<vmem>>, vector<1x8x8x4xbf16>
    %34 = vector.shape_cast %33 : vector<1x8x8x4xbf16> to vector<8x8x4xbf16>
    %35 = vector.shape_cast %34 : vector<8x8x4xbf16> to vector<64x4xbf16>
    %cst_21 = arith.constant dense<0.000000e+00> : vector<64x4xf32>
    %36 = tpu.matmul %35, %2, %cst_21 {dimension_numbers = #tpu.dot_dimension_numbers<[1], [0], [0], [1], [0, 0, 1, 1], [], []>} : vector<64x4xbf16>, vector<4x4xbf16>, vector<64x4xf32> -> vector<64x4xf32>
    %37 = vector.broadcast %3 : vector<1x4xf32> to vector<64x4xf32>
    %38 = arith.addf %36, %37 : vector<64x4xf32>
    %cst_22 = arith.constant 0.000000e+00 : f32
    %39 = vector.broadcast %cst_22 : f32 to vector<64x4xf32>
    %40 = arith.maximumf %38, %39 : vector<64x4xf32>
    %41 = vector.shape_cast %40 : vector<64x4xf32> to vector<8x8x4xf32>
    %42 = tpu.iota {dimensions = array<i32: 1>} : vector<8x8x4xi32>
    %c0_i32 = arith.constant 0 : i32
    %43 = vector.broadcast %c0_i32 : i32 to vector<8x8x4xi32>
    %44 = arith.cmpi eq, %42, %43 : vector<8x8x4xi32>
    %c1_i32 = arith.constant 1 : i32
    %45 = tpu.dynamic_rotate %23 by %c1_i32 dim 1 : vector<8x8x4xf32>, i32 -> vector<8x8x4xf32>
    %cst_23 = arith.constant 0.000000e+00 : f32
    %46 = vector.broadcast %cst_23 : f32 to vector<8x8x4xf32>
    %47 = arith.select %44, %46, %45 : vector<8x8x4xi1>, vector<8x8x4xf32>
    %48 = tpu.concatenate %47, %14, %23 in 2 : vector<8x8x4xf32>, vector<8x8x4xf32>, vector<8x8x4xf32> -> vector<8x8x12xf32>
    %49 = arith.truncf %48 : vector<8x8x12xf32> to vector<8x8x12xbf16>
    %50 = vector.shape_cast %49 : vector<8x8x12xbf16> to vector<64x12xbf16>
    %c0_i32_24 = arith.constant 0 : i32
    %51 = vector.broadcast %c0_i32_24 : i32 to vector<8x8x4xi32>
    %52 = arith.cmpi eq, %42, %51 : vector<8x8x4xi32>
    %c1_i32_25 = arith.constant 1 : i32
    %53 = tpu.dynamic_rotate %41 by %c1_i32_25 dim 1 : vector<8x8x4xf32>, i32 -> vector<8x8x4xf32>
    %cst_26 = arith.constant 0.000000e+00 : f32
    %54 = vector.broadcast %cst_26 : f32 to vector<8x8x4xf32>
    %55 = arith.select %52, %54, %53 : vector<8x8x4xi1>, vector<8x8x4xf32>
    %56 = tpu.concatenate %55, %32, %41 in 2 : vector<8x8x4xf32>, vector<8x8x4xf32>, vector<8x8x4xf32> -> vector<8x8x12xf32>
    %57 = arith.truncf %56 : vector<8x8x12xf32> to vector<8x8x12xbf16>
    %cst_27 = arith.constant 0.000000e+00 : bf16
    %58 = vector.broadcast %cst_27 : bf16 to vector<1x8x12xbf16>
    %c0_28 = arith.constant 0 : index
    %c0_29 = arith.constant 0 : index
    %c0_30 = arith.constant 0 : index
    %59 = vector.load %arg9[%c0_28, %c0_29, %c0_30] : memref<9x8x12xbf16, #tpu.memory_space<vmem>>, vector<1x8x12xbf16>
    tpu.vector_store %arg9[%c0_28, %c0_29, %c0_30], %58 {strides = array<i32>} : memref<9x8x12xbf16, #tpu.memory_space<vmem>>, vector<1x8x12xbf16>,
    %c1 = arith.constant 1 : index
    %c0_31 = arith.constant 0 : index
    %c0_32 = arith.constant 0 : index
    %60 = vector.load %arg9[%c1, %c0_31, %c0_32] : memref<9x8x12xbf16, #tpu.memory_space<vmem>>, vector<8x8x12xbf16>
    tpu.vector_store %arg9[%c1, %c0_31, %c0_32], %57 {strides = array<i32>} : memref<9x8x12xbf16, #tpu.memory_space<vmem>>, vector<8x8x12xbf16>,
    %c0_33 = arith.constant 0 : index
    %c0_34 = arith.constant 0 : index
    %c0_35 = arith.constant 0 : index
    %61 = vector.load %arg9[%c0_33, %c0_34, %c0_35] : memref<9x8x12xbf16, #tpu.memory_space<vmem>>, vector<8x8x12xbf16>
    %62 = vector.shape_cast %61 : vector<8x8x12xbf16> to vector<64x12xbf16>
    %c0_36 = arith.constant 0 : index
    %c0_37 = arith.constant 0 : index
    %c0_38 = arith.constant 0 : index
    %63 = vector.load %arg4[%c0_36, %c0_37, %c0_38] : memref<3x12x4xbf16, #tpu.memory_space<vmem>>, vector<1x12x4xbf16>
    %64 = vector.shape_cast %63 : vector<1x12x4xbf16> to vector<12x4xbf16>
    %cst_39 = arith.constant dense<0.000000e+00> : vector<64x4xf32>
    %65 = tpu.matmul %62, %64, %cst_39 {dimension_numbers = #tpu.dot_dimension_numbers<[1], [0], [0], [1], [0, 0, 1, 1], [], []>} : vector<64x12xbf16>, vector<12x4xbf16>, vector<64x4xf32> -> vector<64x4xf32>
    %c1_40 = arith.constant 1 : index
    %c0_41 = arith.constant 0 : index
    %c0_42 = arith.constant 0 : index
    %66 = vector.load %arg4[%c1_40, %c0_41, %c0_42] : memref<3x12x4xbf16, #tpu.memory_space<vmem>>, vector<1x12x4xbf16>
    %67 = vector.shape_cast %66 : vector<1x12x4xbf16> to vector<12x4xbf16>
    %cst_43 = arith.constant dense<0.000000e+00> : vector<64x4xf32>
    %68 = tpu.matmul %50, %67, %cst_43 {dimension_numbers = #tpu.dot_dimension_numbers<[1], [0], [0], [1], [0, 0, 1, 1], [], []>} : vector<64x12xbf16>, vector<12x4xbf16>, vector<64x4xf32> -> vector<64x4xf32>
    %69 = arith.addf %65, %68 : vector<64x4xf32>
    %c1_44 = arith.constant 1 : index
    %c0_45 = arith.constant 0 : index
    %c0_46 = arith.constant 0 : index
    %70 = vector.load %arg9[%c1_44, %c0_45, %c0_46] : memref<9x8x12xbf16, #tpu.memory_space<vmem>>, vector<8x8x12xbf16>
    %71 = vector.shape_cast %70 : vector<8x8x12xbf16> to vector<64x12xbf16>
    %c2 = arith.constant 2 : index
    %c0_47 = arith.constant 0 : index
    %c0_48 = arith.constant 0 : index
    %72 = vector.load %arg4[%c2, %c0_47, %c0_48] : memref<3x12x4xbf16, #tpu.memory_space<vmem>>, vector<1x12x4xbf16>
    %73 = vector.shape_cast %72 : vector<1x12x4xbf16> to vector<12x4xbf16>
    %cst_49 = arith.constant dense<0.000000e+00> : vector<64x4xf32>
    %74 = tpu.matmul %71, %73, %cst_49 {dimension_numbers = #tpu.dot_dimension_numbers<[1], [0], [0], [1], [0, 0, 1, 1], [], []>} : vector<64x12xbf16>, vector<12x4xbf16>, vector<64x4xf32> -> vector<64x4xf32>
    %75 = arith.addf %69, %74 : vector<64x4xf32>
    %c0_50 = arith.constant 0 : index
    %c0_51 = arith.constant 0 : index
    %76 = vector.load %arg5[%c0_50, %c0_51] : memref<1x4xf32, #tpu.memory_space<vmem>>, vector<1x4xf32>
    %77 = vector.broadcast %76 : vector<1x4xf32> to vector<64x4xf32>
    %78 = arith.addf %75, %77 : vector<64x4xf32>
    %cst_52 = arith.constant 0.000000e+00 : f32
    %79 = vector.broadcast %cst_52 : f32 to vector<64x4xf32>
    %80 = arith.maximumf %78, %79 : vector<64x4xf32>
    %81 = arith.truncf %80 : vector<64x4xf32> to vector<64x4xbf16>
    %c0_53 = arith.constant 0 : index
    %c0_54 = arith.constant 0 : index
    %82 = vector.load %arg6[%c0_53, %c0_54] : memref<4x16xbf16, #tpu.memory_space<vmem>>, vector<4x16xbf16>
    %cst_55 = arith.constant dense<0.000000e+00> : vector<64x16xf32>
    %83 = tpu.matmul %81, %82, %cst_55 {dimension_numbers = #tpu.dot_dimension_numbers<[1], [0], [0], [1], [0, 0, 1, 1], [], []>} : vector<64x4xbf16>, vector<4x16xbf16>, vector<64x16xf32> -> vector<64x16xf32>
    %c0_56 = arith.constant 0 : index
    %c0_57 = arith.constant 0 : index
    %84 = vector.load %arg7[%c0_56, %c0_57] : memref<1x16xf32, #tpu.memory_space<vmem>>, vector<1x16xf32>
    %85 = vector.broadcast %84 : vector<1x16xf32> to vector<64x16xf32>
    %86 = arith.addf %83, %85 : vector<64x16xf32>
    %87 = arith.addf %86, %10 : vector<64x16xf32>
    %cst_58 = arith.constant 0.000000e+00 : f32
    %88 = vector.broadcast %cst_58 : f32 to vector<64x16xf32>
    %89 = arith.maximumf %87, %88 : vector<64x16xf32>
    %90 = vector.shape_cast %89 : vector<64x16xf32> to vector<1x8x8x16xf32>
    %c0_59 = arith.constant 0 : index
    %c0_60 = arith.constant 0 : index
    %c0_61 = arith.constant 0 : index
    %c0_62 = arith.constant 0 : index
    %91 = vector.load %arg8[%c0_59, %c0_60, %c0_61, %c0_62] : memref<1x8x8x16xf32, #tpu.memory_space<vmem>>, vector<1x8x8x16xf32>
    tpu.vector_store %arg8[%c0_59, %c0_60, %c0_61, %c0_62], %90 {strides = array<i32>} : memref<1x8x8x16xf32, #tpu.memory_space<vmem>>, vector<1x8x8x16xf32>,
    return
  }
  func.func @transform_0(%arg0: i32) -> (i32, i32, i32, i32) {
    %c0_i32 = arith.constant 0 : i32
    %c0_i32_0 = arith.constant 0 : i32
    %c0_i32_1 = arith.constant 0 : i32
    %c0_i32_2 = arith.constant 0 : i32
    return %arg0, %c0_i32, %c0_i32_0, %c0_i32_1 : i32, i32, i32, i32
  }
  func.func @transform_1(%arg0: i32) -> (i32, i32) {
    %c0_i32 = arith.constant 0 : i32
    %c0_i32_0 = arith.constant 0 : i32
    %c0_i32_1 = arith.constant 0 : i32
    return %c0_i32, %c0_i32_0 : i32, i32
  }
  func.func @transform_2(%arg0: i32) -> (i32, i32) {
    %c0_i32 = arith.constant 0 : i32
    %c0_i32_0 = arith.constant 0 : i32
    %c0_i32_1 = arith.constant 0 : i32
    return %c0_i32, %c0_i32_0 : i32, i32
  }
  func.func @transform_3(%arg0: i32) -> (i32, i32, i32) {
    %c0_i32 = arith.constant 0 : i32
    %c0_i32_0 = arith.constant 0 : i32
    %c0_i32_1 = arith.constant 0 : i32
    %c0_i32_2 = arith.constant 0 : i32
    return %c0_i32, %c0_i32_0, %c0_i32_1 : i32, i32, i32
  }
  func.func @transform_4(%arg0: i32) -> (i32, i32) {
    %c0_i32 = arith.constant 0 : i32
    %c0_i32_0 = arith.constant 0 : i32
    %c0_i32_1 = arith.constant 0 : i32
    return %c0_i32, %c0_i32_0 : i32, i32
  }
  func.func @transform_5(%arg0: i32) -> (i32, i32) {
    %c0_i32 = arith.constant 0 : i32
    %c0_i32_0 = arith.constant 0 : i32
    %c0_i32_1 = arith.constant 0 : i32
    return %c0_i32, %c0_i32_0 : i32, i32
  }
  func.func @transform_6(%arg0: i32) -> (i32, i32) {
    %c0_i32 = arith.constant 0 : i32
    %c0_i32_0 = arith.constant 0 : i32
    %c0_i32_1 = arith.constant 0 : i32
    return %c0_i32, %c0_i32_0 : i32, i32
  }
  func.func @transform_7(%arg0: i32) -> (i32, i32, i32, i32) {
    %c0_i32 = arith.constant 0 : i32
    %c0_i32_0 = arith.constant 0 : i32
    %c0_i32_1 = arith.constant 0 : i32
    %c0_i32_2 = arith.constant 0 : i32
    return %arg0, %c0_i32, %c0_i32_0, %c0_i32_1 : i32, i32, i32, i32
  }
}

</mosaic_0001>

<bundles_post_ra>
// kernel: bottleneck_forward.1
= control target key start
LH: loop header
LB: loop body
LE: loop exit
PB: predicated region body
PF: predicated region fallthrough
CT: control target
= control target key end

     0   :  { %12 = vsyncpa [#allocation4], 0  ;;  %s2143_s0 = inlined_call_operand.vmem [shape: bf16[2,8,8,16], index: 0, kind: input, shape index: {}]   ;;  %s2144_s1 = inlined_call_operand.vmem [shape: bf16[4,20], index: 1, kind: input, shape index: {}]   ;;  %s2145_s2 = inlined_call_operand.vmem [shape: f32[1,20], index: 2, kind: input, shape index: {}]   ;;  %s2146_s3 = inlined_call_operand.vmem [shape: bf16[3,12,4], index: 3, kind: input, shape index: {}]   ;;  %s2147_s4 = inlined_call_operand.vmem [shape: f32[1,4], index: 4, kind: input, shape index: {}]   ;;  %s2148_s5 = inlined_call_operand.vmem [shape: bf16[4,16], index: 5, kind: input, shape index: {}]   ;;  %s2149_s6 = inlined_call_operand.vmem [shape: f32[1,16], index: 6, kind: input, shape index: {}]   ;;  %s2150_s7 = inlined_call_operand.hbm [shape: f32[2,8,8,16], index: 7, kind: output, shape index: {}]  }
   0x1   :  { %14 = vsyncpa [#allocation4 + $0x1], 0  ;;  %s1666_s24 = smov 0   ;;  %s1668_s25 = smov 0  }
   0x2   :  { %s1670_s26 = smov 0   ;;  %s1672_s27 = smov 0  }
   0x3 LB: > { %s1687_s28 = sadd.s32 4294967295, %s1616_s27   ;;  %s1259_s29 = sadd.s32 4294967294, %s1616_s27   ;;  %s1616_s27 = sphi %s1672_s27, %s2156_s27   ;;  %s1612_s26 = sphi %s1670_s26, %s2155_s26   ;;  %s1608_s25 = sphi %s1668_s25, %s2154_s25   ;;  %s1604_s24 = sphi %s1666_s24, %s2153_s24  }
   0x4   : > { %s1691_s30 = sadd.s32 1, %s1616_s27   ;;  %s179_s8 = sadd.s32 1, %s1612_s26 }
   0x5   : > { %s176_s9 = ssub.s32 %s1616_s27, %s1691_s30  ;;  %p189_p0 = scmp.ne.s32.totalorder %s1612_s26, %s1608_s25 }
   0x6   : > { %p177_p1 = scmp.eq.s32.totalorder %s176_s9, 0  ;;  %p190_p2 = scmp.eq.s32.totalorder %s1687_s28, 1 }
   0x7   : > { %p195_p3 = scmp.ne.s32.totalorder %s1608_s25, %s1604_s24  ;;  %p196_p4 = scmp.eq.s32.totalorder %s1259_s29, 1 }
   0x8   : > { %s1702_s10 = scalar_select %p177_p1, %s1612_s26, %s179_s8  }
   0x9   : > { %p1704_p5 = por %p190_p2, %p189_p0  ;;  %p1708_p6 = por %p196_p4, %p195_p3 }
   0xa   : > { %p1262_p7 = scmp.ge.s32.totalorder %s1616_s27, 1  ;;  %p240_p8 = scmp.lt.s32.totalorder %s1616_s27, 3 }
   0xc   : > { %p241_p9 = pnand %p1262_p7, %p240_p8 }
   0xd   : > { %p272_p10 = scmp.lt.s32.totalorder (!%p241_p9), %s1687_s28, 1  ;;  %s1618_s20 = smov (!%p241_p9), 120  }
   0xe   : > { %244 = sbr.rel (%p241_p9) target bundleno = 785 (0x311), region = 48  ;;  %s1619_s21 = smov (!%p241_p9), 112  }
   0xf   : > { %s1620_s22 = smov (!%p241_p9), 116   ;;  %s1621_s23 = smov (!%p241_p9), 124  }
  0x10   : > { %s1622_s9 = smov (!%p241_p9), 4   ;;  %s1623_s13 = smov (!%p241_p9), 8  }
  0x13   : > { %v278_v0 = vld [vmem:[%s2144_s1] sm:$0x3]  ;;  %vm324_vm0 = vcmask 1041408   ;;  %s273_s15 = scalar_select %p272_p10, %s1687_s28, 1  ;;  %vm311_vm1 = vcmask 31744   ;;  %vm893_vm2 = vcmask 1045504  }
  0x14   : > { %373 = vst [vmem:[#allocation1] ss:$4 sm:$0xff] %v278_v0  ;;  %v326_v1 = vsel %vm324_vm0, %v278_v0, 0  ;;  %v1752_v19 = vld [vmem:[%s2145_s2] ss:$0 sm:$0xff]  ;;  %vm831_vm3 = vcmask 93184  }
  0x15   : > { %335 = vmatpush.bf16.msra.mxu0 %v326_v1  ;;  %s1399_s16 = sshll.u32 %s273_s15, 5  ;;  %vm710_vm5 = vcmask 64512   ;;  %vm880_vm6 = vcmask 97280   ;;  %vm1172_vm7 = vcmask 130048  }
  0x16   : > { %s1723_s19 = scalar_lea.vmem %s2143_s0, %s1399_s16 }
  0x17   : > { %v1404_v2 = vld [vmem:[%s1723_s19] sm:$0xff]  ;;  %v1405_v6 = vld [vmem:[%s1723_s19 + $0x8] sm:$0xff]  ;;  %v1406_v9 = vld [vmem:[%s1723_s19 + $0x10] sm:$0xff] }
  0x18   : > { %v1400_v3 = vld [vmem:[%s1723_s19] sm:$0xff]  ;;  %461 = vrot.lane.b32.xlu1 %v1404_v2, %s1618_s20  ;;  %v1409_v8 = vld [vmem:[%s1723_s19 + $0x8] sm:$0xff]  ;;  %v1410_v12 = vld [vmem:[%s1723_s19 + $0x10] sm:$0xff] }
  0x19   : > { %1282 = vmatmul.msk.bf16.vlgmr.msra.gmra.mxu0 %vm311_vm1, %v1400_v3  ;;  %v1408_v5 = vld [vmem:[%s1723_s19] sm:$0xff]  ;;  %v1401_v10 = vld [vmem:[%s1723_s19 + $0x8] sm:$0xff]  ;;  %v1407_v13 = vld [vmem:[%s1723_s19 + $0x18] sm:$0xff] }
  0x1a   : > { %v1411_v14 = vld [vmem:[%s1723_s19 + $0x18] sm:$0xff]  ;;  %v1402_v16 = vld [vmem:[%s1723_s19 + $0x10] sm:$0xff] }
  0x1b   : > { %v374_v4 = vld.sshfl [vmem:[#allocation1] sm:$0xff pattern:$0x73625140]  ;;  %v1403_v15 = vld [vmem:[%s1723_s19 + $0x18] sm:$0xff]  ;;  %s269_s19 = sand.u32 1, %s1608_s25  }
  0x1c   : > { %469 = vst [vmem:[#allocation1] ss:$4 sm:$0xff] %v278_v0  ;;  %376 = vrot.lane.b32.xlu2 %v374_v4, %s1619_s21 }
  0x20   : > { %554 = vrot.lane.b32.xlu1 %v1408_v5, %s1620_s22 }
  0x23   : > { %v470_v7 = vld.sshfl [vmem:[#allocation1] sm:$0xff pattern:$0x73625140] }
  0x24   : > { %472 = vrot.lane.b32.xlu0 %v470_v7, %s1619_s21  ;;  %562 = vst [vmem:[#allocation1] ss:$4 sm:$0xff] %v278_v0  ;;  %463 = vrot.lane.b32.xlu2 %v1405_v6, %s1618_s20 }
  0x28   : > { %556 = vrot.lane.b32.xlu1 %v1409_v8, %s1620_s22 }
  0x29   : > { %1283 = vmatmul.msk.bf16.gmra.mxu0 %vm311_vm1, %v1401_v10 }
  0x2b   : > { %v563_v11 = vld.sshfl [vmem:[#allocation1] sm:$0xff pattern:$0x73625140] }
  0x2c   : > { %565 = vrot.lane.b32.xlu0 %v563_v11, %s1619_s21  ;;  %465 = vrot.lane.b32.xlu2 %v1406_v9, %s1618_s20 }
  0x30   : > { %558 = vrot.lane.b32.xlu1 %v1410_v12, %s1620_s22 }
  0x34   : > { %365 = vrot.lane.b32.xlu0 %v1400_v3, %s1621_s23  ;;  %467 = vrot.lane.b32.xlu2 %v1407_v13, %s1618_s20  ;;  %s1263_s20 = sshll.u32 %s269_s19, 6 }
  0x38   : > { %560 = vrot.lane.b32.xlu1 %v1411_v14, %s1620_s22 }
  0x39   : > { %1284 = vmatmul.msk.bf16.gmra.mxu0 %vm311_vm1, %v1402_v16 }
  0x3c   : > { %367 = vrot.lane.b32.xlu0 %v1401_v10, %s1621_s23  ;;  %371 = vrot.lane.b32.xlu2 %v1403_v15, %s1621_s23 }
  0x44   : > { %369 = vrot.lane.b32.xlu0 %v1402_v16, %s1621_s23  ;;  %s1423_s23 = sshll.u32 %s1687_s28, 6  ;;  %s1182_s28 = scalar_lea.sflag [#allocation4], %s269_s19 }
  0x45   : > { %s1193_s14 = scalar_lea.hbm %s2150_s7, %s1423_s23 }
  0x49   : > { %1285 = vmatmul.msk.bf16.gmra.mxu0 %vm311_vm1, %v1403_v15 }
  0x4c   : > { %378 = vrot.lane.b32.xlu0 %v1752_v19, %s1619_s21  ;;  %s2083_s21 = scalar_lea.vmem [#allocation3], %s1263_s20  ;;  %s1574_s20 = scalar_lea.hbm %s2150_s7, 128 }
  0x76   : > { %v377_v17 = vpop.permute.xlu2 %376 }
  0x77   : > { %v394_v18 = vsel %vm324_vm0, %v377_v17, 0 }
  0x78   : > { %403 = vmatpush.bf16.msra.mxu1 %v394_v18 }
  0x7e   : > { %v464_v34 = vpop.permute.xlu2 %463 }
  0x86   : > { %v466_v37 = vpop.permute.xlu2 %465 }
  0x8a   : > { %v462_v21 = vpop.permute.xlu1 %461 }
  0x8e   : > { %v468_v40 = vpop.permute.xlu2 %467 }
  0x92   : > { %v555_v27 = vpop.permute.xlu1 %554 }
  0x96   : > { %v473_v20 = vpop.permute.xlu0 %472  ;;  %v337_v23 = vpop.f32.mrf.mxu0 }
  0x97   : > { %v487_v22 = vsel %vm324_vm0, %v473_v20, 0  ;;  %v1759_v24 = vadd.f32 %v1752_v19, %v337_v23  ;;  %v372_v42 = vpop.permute.xlu2 %371 }
  0x98   : > { %496 = vmatpush.bf16.msra.mxu2 %v487_v22 }
  0x99   : > { %v357_v29 = vmax.f32 %v1759_v24, 0.0 }
  0x9a   : > { %v557_v35 = vpop.permute.xlu1 %556 }
  0x9b   : > { %1306 = vmatmul.msk.bf16.vlgmr.msra.gmra.mxu2 %vm311_vm1, %v462_v21 }
  0x9e   : > { %v566_v25 = vpop.permute.xlu0 %565  ;;  %v339_v28 = vpop.f32.mrf.mxu0 }
  0x9f   : > { %v580_v26 = vsel %vm324_vm0, %v566_v25, 0  ;;  %v1764_v30 = vadd.f32 %v1752_v19, %v339_v28 }
  0xa0   : > { %589 = vmatpush.bf16.msra.mxu3 %v580_v26 }
  0xa1   : > { %v358_v31 = vmax.f32 %v1764_v30, 0.0 }
  0xa2   : > { %v559_v38 = vpop.permute.xlu1 %558 }
  0xa3   : > { %1326 = vmatmul.msk.bf16.vlgmr.msra.gmra.mxu3 %vm311_vm1, %v555_v27  ;;  %v1481_v32 = vpack.i.bf16 %v358_v31, %v357_v29 }
  0xa5   : > { %1482 = vrot.lane.b32.xlu0 %v1481_v32, %s1620_s22 }
  0xa6   : > { %v366_v33 = vpop.permute.xlu0 %365  ;;  %v342_v43 = vpop.f32.mrf.mxu0 }
  0xa7   : > { %1286 = vmatmul.msk.bf16.vlgmr.msra.gmra.mxu1 %vm311_vm1, %v366_v33  ;;  %v1799_v1 = vadd.f32 %v1752_v19, %v342_v43  ;;  %v1422_v43 = vld [vmem:[%s2146_s3 + $0x10] sm:$0x30] }
  0xa9   : > { %v359_v8 = vmax.f32 %v1799_v1, 0.0 }
  0xaa   : > { %v561_v41 = vpop.permute.xlu1 %560 }
  0xab   : > { %1307 = vmatmul.msk.bf16.gmra.mxu2 %vm311_vm1, %v464_v34 }
  0xae   : > { %v368_v36 = vpop.permute.xlu0 %367  ;;  %v344_v48 = vpop.f32.mrf.mxu0 }
  0xaf   : > { %v1808_v5 = vadd.f32 %v1752_v19, %v344_v48  ;;  %v1334_v48 = vld [vmem:[%s2146_s3 + $0x8] sm:$0xf] }
  0xb1   : > { %v360_v10 = vmax.f32 %v1808_v5, 0.0 }
  0xb3   : > { %1327 = vmatmul.msk.bf16.gmra.mxu3 %vm311_vm1, %v557_v35  ;;  %v1501_v16 = vpack.i.bf16 %v360_v10, %v359_v8 }
  0xb6   : > { %v370_v39 = vpop.permute.xlu0 %369  ;;  %v347_v0 = vpop.f32.mrf.mxu0 }
  0xb7   : > { %1287 = vmatmul.msk.bf16.gmra.mxu1 %vm311_vm1, %v368_v36  ;;  %v1836_v29 = vadd.f32 %v1752_v19, %v347_v0 }
  0xbb   : > { %1308 = vmatmul.msk.bf16.gmra.mxu2 %vm311_vm1, %v466_v37 }
  0xbe   : > { %v1779_v45 = vpop.permute.xlu0 %378  ;;  %v349_v17 = vpop.f32.mrf.mxu0 }
  0xbf   : > { %v1842_v34 = vadd.f32 %v1752_v19, %v349_v17 }
  0xc3   : > { %1328 = vmatmul.msk.bf16.gmra.mxu3 %vm311_vm1, %v559_v38  ;;  %v361_v38 = vmax.f32 %v1836_v29, 0.0 }
  0xc6   : > { %v352_v37 = vpop.f32.mrf.mxu0 }
  0xc7   : > { %1288 = vmatmul.msk.bf16.gmra.mxu1 %vm311_vm1, %v370_v39  ;;  %v1895_v17 = vadd.f32 %v1752_v19, %v352_v37 }
  0xcb   : > { %1309 = vmatmul.msk.bf16.gmra.mxu2 %vm311_vm1, %v468_v40 }
  0xd3   : > { %1329 = vmatmul.msk.bf16.gmra.mxu3 %vm311_vm1, %v561_v41  ;;  %v362_v41 = vmax.f32 %v1842_v34, 0.0 }
  0xd5   : > { %v1521_v0 = vpack.i.bf16 %v362_v41, %v361_v38  ;;  %v363_v38 = vmax.f32 %v1895_v17, 0.0 }
  0xd7   : > { %1289 = vmatmul.msk.bf16.gmra.mxu1 %vm311_vm1, %v372_v42  ;;  %v1384_v42 = vld [vmem:[%s2146_s3 + $0x10] sm:$0xf] }
 0x11e   : > { %v498_v44 = vpop.f32.mrf.mxu2 }
 0x11f   : > { %v499_v47 = vadd.f32 %v498_v44, %v1779_v45 }
 0x121   : > { %v518_v53 = vmax.f32 %v499_v47, 0.0  ;;  %v1385_v47 = vor.u32 %v1422_v43, %v1384_v42 }
 0x124   : > { %v405_v46 = vpop.f32.mrf.mxu1 }
 0x125   : > { %v1784_v52 = vadd.f32 %v405_v46, %v1779_v45 }
 0x126   : > { %v500_v49 = vpop.f32.mrf.mxu2  ;;  %v591_v50 = vpop.f32.mrf.mxu3 }
 0x127   : > { %v501_v51 = vadd.f32 %v500_v49, %v1779_v45  ;;  %v425_v57 = vmax.f32 %v1784_v52, 0.0  ;;  %v1788_v58 = vadd.f32 %v591_v50, %v1779_v45  ;;  %v1417_v49 = vld [vmem:[%s2146_s3 + $0x8] sm:$0x30]  ;;  %v1358_v50 = vld [vmem:[%s2146_s3] sm:$0xf] }
 0x129   : > { %v519_v54 = vmax.f32 %v501_v51, 0.0  ;;  %v611_v2 = vmax.f32 %v1788_v58, 0.0  ;;  %v622_v58 = vrot.slane %v425_v57, 7 }
 0x12b   : > { %v1471_v55 = vpack.i.bf16 %v519_v54, %v518_v53  ;;  %v1335_v53 = vor.u32 %v1417_v49, %v1334_v48  ;;  %v1416_v54 = vld [vmem:[%s2146_s3] sm:$0x30] }
 0x12c   : > { %v407_v56 = vpop.f32.mrf.mxu1 }
 0x12d   : > { %v1791_v59 = vadd.f32 %v407_v56, %v1779_v45  ;;  %1472 = vrot.lane.b32.xlu1 %v1471_v55, %s1622_s9  ;;  %v1044_v55 = vsel %vm893_vm2, %v1385_v47, 0  ;;  %v1359_v56 = vor.u32 %v1416_v54, %v1358_v50 }
 0x12e   : > { %v503_v60 = vpop.f32.mrf.mxu2  ;;  %v593_v61 = vpop.f32.mrf.mxu3  ;;  %1053 = vmatpush.bf16.msrb.mxu2 %v1044_v55 }
 0x12f   : > { %v426_v62 = vmax.f32 %v1791_v59, 0.0  ;;  %v1796_v63 = vadd.f32 %v593_v61, %v1779_v45  ;;  %v504_v9 = vadd.f32 %v503_v60, %v1779_v45 }
 0x131   : > { %v1486_v3 = vpack.i.bf16 %v426_v62, %v425_v57  ;;  %v612_v4 = vmax.f32 %v1796_v63, 0.0  ;;  %v520_v14 = vmax.f32 %v504_v9, 0.0  ;;  %v623_v63 = vrot.slane %v426_v62, 7 }
 0x133   : > { %v1476_v6 = vpack.i.bf16 %v612_v4, %v611_v2 }
 0x134   : > { %v410_v7 = vpop.f32.mrf.mxu1 }
 0x135   : > { %1477 = vrot.lane.b32.xlu2 %v1476_v6, %s1623_s13  ;;  %1487 = vrot.lane.b32.xlu1 %v1486_v3, %s1623_s13  ;;  %v1821_v21 = vadd.f32 %v410_v7, %v1779_v45  ;;  %v895_v3 = vsel %vm893_vm2, %v1335_v53, 0  ;;  %v964_v6 = vsel %vm893_vm2, %v1359_v56, 0 }
 0x136   : > { %v505_v11 = vpop.f32.mrf.mxu2  ;;  %v596_v12 = vpop.f32.mrf.mxu3  ;;  %904 = vmatpush.bf16.msrb.mxu0 %v895_v3  ;;  %973 = vmatpush.bf16.msrb.mxu1 %v964_v6  ;;  %v619_v6 = vlaneseq }
 0x137   : > { %v506_v13 = vadd.f32 %v505_v11, %v1779_v45  ;;  %v1824_v22 = vadd.f32 %v596_v12, %v1779_v45  ;;  %v427_v31 = vmax.f32 %v1821_v21, 0.0  ;;  %v354_v12 = vpop.f32.mrf.mxu0 }
 0x139   : > { %v521_v15 = vmax.f32 %v506_v13, 0.0  ;;  %v613_v32 = vmax.f32 %v1824_v22, 0.0 }
 0x13b   : > { %v1491_v18 = vpack.i.bf16 %v521_v15, %v520_v14 }
 0x13c   : > { %v412_v20 = vpop.f32.mrf.mxu1 }
 0x13d   : > { %v1827_v23 = vadd.f32 %v412_v20, %v1779_v45  ;;  %1492 = vrot.lane.b32.xlu2 %v1491_v18, %s1622_s9  ;;  %1502 = vrot.lane.b32.xlu1 %v1501_v16, %s1620_s22 }
 0x13e   : > { %v508_v25 = vpop.f32.mrf.mxu2  ;;  %v598_v26 = vpop.f32.mrf.mxu3 }
 0x13f   : > { %v428_v27 = vmax.f32 %v1827_v23, 0.0  ;;  %v1833_v28 = vadd.f32 %v598_v26, %v1779_v45  ;;  %v509_v40 = vadd.f32 %v508_v25, %v1779_v45  ;;  %v1901_v26 = vadd.f32 %v1752_v19, %v354_v12 }
 0x140   : > { %v727_v12 = vrot.slane %v611_v2, 7  ;;  %v1483_v2 = vpop.permute.xlu0 %1482 }
 0x141   : > { %v614_v33 = vmax.f32 %v1833_v28, 0.0  ;;  %v1506_v35 = vpack.i.bf16 %v428_v27, %v427_v31  ;;  %v522_v60 = vmax.f32 %v509_v40, 0.0  ;;  %v364_v19 = vmax.f32 %v1901_v26, 0.0 }
 0x143   : > { %v1496_v36 = vpack.i.bf16 %v614_v33, %v613_v32 }
 0x144   : > { %v415_v39 = vpop.f32.mrf.mxu1 }
 0x145   : > { %1507 = vrot.lane.b32.xlu2 %v1506_v35, %s1623_s13  ;;  %1497 = vrot.lane.b32.xlu0 %v1496_v36, %s1623_s13  ;;  %v1880_v9 = vadd.f32 %v415_v39, %v1779_v45 }
 0x146   : > { %v510_v44 = vpop.f32.mrf.mxu2  ;;  %v601_v46 = vpop.f32.mrf.mxu3 }
 0x147   : > { %v511_v51 = vadd.f32 %v510_v44, %v1779_v45  ;;  %v1883_v10 = vadd.f32 %v601_v46, %v1779_v45  ;;  %v429_v18 = vmax.f32 %v1880_v9, 0.0  ;;  %v1541_v46 = vpack.i.bf16 %v364_v19, %v363_v38 }
 0x149   : > { %v523_v61 = vmax.f32 %v511_v51, 0.0  ;;  %v615_v20 = vmax.f32 %v1883_v10, 0.0 }
 0x14b   : > { %v1511_v7 = vpack.i.bf16 %v523_v61, %v522_v60 }
 0x14c   : > { %v417_v8 = vpop.f32.mrf.mxu1 }
 0x14d   : > { %v1886_v11 = vadd.f32 %v417_v8, %v1779_v45  ;;  %1522 = vrot.lane.b32.xlu2 %v1521_v0, %s1620_s22  ;;  %1512 = vrot.lane.b32.xlu0 %v1511_v7, %s1622_s9  ;;  %v1946_v7 = vshrl.u32 %v619_v6, 7 }
 0x14e   : > { %v513_v13 = vpop.f32.mrf.mxu2  ;;  %v603_v14 = vpop.f32.mrf.mxu3 }
 0x14f   : > { %v430_v15 = vmax.f32 %v1886_v11, 0.0  ;;  %v1892_v16 = vadd.f32 %v603_v14, %v1779_v45  ;;  %v514_v39 = vadd.f32 %v513_v13, %v1779_v45  ;;  %v728_v13 = vrot.slane %v612_v4, 7 }
 0x150   : > { %vm621_vm4 = vcmp.eq.s32.totalorder %v1946_v7, 0 }
 0x151   : > { %v616_v25 = vmax.f32 %v1892_v16, 0.0  ;;  %v1526_v35 = vpack.i.bf16 %v430_v15, %v429_v18  ;;  %v524_v43 = vmax.f32 %v514_v39, 0.0  ;;  %v736_v38 = vsel %vm621_vm4, 0.0, %v728_v13 }
 0x152   : > { %v630_v52 = vsel %vm621_vm4, 0.0, %v622_v58  ;;  %v631_v57 = vsel %vm621_vm4, 0.0, %v623_v63  ;;  %v624_v13 = vrot.slane %v427_v31, 7 }
 0x153   : > { %v1516_v36 = vpack.i.bf16 %v616_v25, %v615_v20 }
 0x154   : > { %v420_v37 = vpop.f32.mrf.mxu1  ;;  %v632_v21 = vsel %vm621_vm4, 0.0, %v624_v13 }
 0x155   : > { %1517 = vrot.lane.b32.xlu1 %v1516_v36, %s1623_s13  ;;  %1527 = vrot.lane.b32.xlu0 %v1526_v35, %s1623_s13  ;;  %v1918_v49 = vadd.f32 %v420_v37, %v1779_v45  ;;  %v735_v37 = vsel %vm621_vm4, 0.0, %v727_v12 }
 0x156   : > { %v515_v40 = vpop.f32.mrf.mxu2  ;;  %v606_v41 = vpop.f32.mrf.mxu3 }
 0x157   : > { %v516_v42 = vadd.f32 %v515_v40, %v1779_v45  ;;  %v1921_v50 = vadd.f32 %v606_v41, %v1779_v45  ;;  %v431_v56 = vmax.f32 %v1918_v49, 0.0 }
 0x159   : > { %v525_v44 = vmax.f32 %v516_v42, 0.0  ;;  %v617_v60 = vmax.f32 %v1921_v50, 0.0 }
 0x15b   : > { %v1531_v47 = vpack.i.bf16 %v525_v44, %v524_v43 }
 0x15c   : > { %v422_v48 = vpop.f32.mrf.mxu1 }
 0x15d   : > { %v1924_v51 = vadd.f32 %v422_v48, %v1779_v45  ;;  %1532 = vrot.lane.b32.xlu1 %v1531_v47, %s1622_s9  ;;  %1542 = vrot.lane.b32.xlu0 %v1541_v46, %s1620_s22  ;;  %v1485_v47 = vunpack.i.h.bf16 %v1483_v2  ;;  %v1484_v48 = vunpack.i.l.bf16 %v1483_v2  ;;  %s1194_s22 = sshll.u32 %s2083_s21, 4  ;;  %s1196_s9 = sshll.u32 %s1193_s14, 4  ;;  %s1195_s22 = int_to_ptr.vmem [resolvable:$true] %s1194_s22  ;;  %s1197_s9 = int_to_ptr.hbm [resolvable:$true] %s1196_s9 }
 0x15e   : > { %v608_v53 = vpop.f32.mrf.mxu3  ;;  %s1568_s15 = sshra.s32 %s1197_s9, 4  ;;  %s1569_s15 = int_to_ptr.hbm [resolvable:$true] %s1568_s15 }
 0x15f   : > { %v432_v54 = vmax.f32 %v1924_v51, 0.0  ;;  %v1930_v55 = vadd.f32 %v608_v53, %v1779_v45  ;;  %v1624_v45 = vmov 0   ;;  %s1570_s16 = scalar_lea.hbm %s1569_s15, 64  ;;  %p1575_p0 = scmp.lt.s32.totalorder %s1569_s15, %s2150_s7 }
 0x160   : > { %832 = vst.msk [vmem:[#allocation2] sm:$0xf] %vm831_vm3, %v1624_v45  ;;  %p1571_p11 = scmp.ne.s32.totalorder %s1569_s15, %s1570_s16  ;;  %p1576_p1 = scmp.lt.s32.totalorder %s1574_s20, %s1570_s16 }
 0x161   : > { %v618_v61 = vmax.f32 %v1930_v55, 0.0  ;;  %v1546_v0 = vpack.i.bf16 %v432_v54, %v431_v56 }
 0x162   : > { %p1572_p12 = pnand %p1571_p11, %p1704_p5  ;;  %p1577_p2 = por %p1576_p1, %p1575_p0 }
 0x163   : > { %v1536_v3 = vpack.i.bf16 %v618_v61, %v617_v60 }
 0x164   : > { %p1573_p13 = pneg %p1572_p12 }
 0x165   : > { %1537 = vrot.lane.b32.xlu2 %v1536_v3, %s1623_s13  ;;  %1547 = vrot.lane.b32.xlu1 %v1546_v0, %s1623_s13  ;;  %v703_v0 = vsel %vm311_vm1, %v631_v57, %v1485_v47  ;;  %v702_v3 = vsel %vm311_vm1, %v630_v52, %v1484_v48 }
 0x166   : > { %p1578_p3 = pnand %p1577_p2, %p1573_p13 }
 0x18f   : > { %v1478_v8 = vpop.permute.xlu2 %1477 }
 0x190   : > { %v1480_v39 = vunpack.i.h.bf16 %v1478_v8  ;;  %v1479_v19 = vunpack.i.l.bf16 %v1478_v8 }
 0x197   : > { %v1493_v43 = vpop.permute.xlu2 %1492 }
 0x198   : > { %v1495_v52 = vunpack.i.h.bf16 %v1493_v43  ;;  %v1494_v57 = vunpack.i.l.bf16 %v1493_v43 }
 0x19f   : > { %v1473_v14 = vpop.permute.xlu1 %1472 }
 0x1a0   : > { %v1475_v35 = vunpack.i.h.bf16 %v1473_v14  ;;  %v1474_v36 = vunpack.i.l.bf16 %v1473_v14  ;;  %v625_v14 = vrot.slane %v428_v27, 7 }
 0x1a2   : > { %v808_v4 = vsel %vm311_vm1, %v736_v38, %v1475_v35  ;;  %v807_v40 = vsel %vm311_vm1, %v735_v37, %v1474_v36  ;;  %v1508_v37 = vpop.permute.xlu2 %1507  ;;  %v633_v23 = vsel %vm621_vm4, 0.0, %v625_v14 }
 0x1a3   : > { %v816_v41 = vsel %vm710_vm5, %v808_v4, %v1480_v39  ;;  %v815_v42 = vsel %vm710_vm5, %v807_v40, %v1479_v19  ;;  %v1510_v27 = vunpack.i.h.bf16 %v1508_v37  ;;  %v1509_v31 = vunpack.i.l.bf16 %v1508_v37 }
 0x1a4   : > { %v824_v44 = vpack.c.bf16 %v816_v41, %v816_v41  ;;  %v823_v46 = vpack.c.bf16 %v815_v42, %v815_v42  ;;  %v729_v41 = vrot.slane %v613_v32, 7  ;;  %v731_v37 = vrot.slane %v615_v20, 7  ;;  %v1107_v20 = vld [vmem:[%s2148_s5] sm:$0x3] }
 0x1a6   : > { %835 = vst.msk [vmem:[#allocation2 + $0x8] sm:$0xf] %vm831_vm3, %v824_v44  ;;  %v739_v9 = vsel %vm621_vm4, 0.0, %v731_v37  ;;  %v629_v37 = vrot.slane %v432_v54, 7 }
 0x1a7   : > { %834 = vst.msk [vmem:[#allocation2 + $0x4] sm:$0xf] %vm831_vm3, %v823_v46  ;;  %v1488_v59 = vpop.permute.xlu1 %1487  ;;  %v730_v46 = vrot.slane %v614_v33, 7 }
 0x1a8   : > { %v1490_v62 = vunpack.i.h.bf16 %v1488_v59  ;;  %v1489_v53 = vunpack.i.l.bf16 %v1488_v59  ;;  %v637_v51 = vsel %vm621_vm4, 0.0, %v629_v37 }
 0x1a9   : > { %v738_v22 = vsel %vm621_vm4, 0.0, %v730_v46 }
 0x1aa   : > { %v711_v45 = vsel %vm710_vm5, %v702_v3, %v1489_v53  ;;  %v712_v6 = vsel %vm710_vm5, %v703_v0, %v1490_v62  ;;  %v737_v53 = vsel %vm621_vm4, 0.0, %v729_v41  ;;  %v1523_v14 = vpop.permute.xlu2 %1522 }
 0x1ab   : > { %v719_v8 = vpack.c.bf16 %v711_v45, %v711_v45  ;;  %v720_v12 = vpack.c.bf16 %v712_v6, %v712_v6  ;;  %v810_v6 = vsel %vm311_vm1, %v738_v22, %v1495_v52  ;;  %v809_v28 = vsel %vm311_vm1, %v737_v53, %v1494_v57 }
 0x1ac   : > { %v734_v22 = vrot.slane %v618_v61, 7 }
 0x1ad   : > { %v863_v35 = vunpack.c.l.b16 %v719_v8  ;;  %v864_v36 = vunpack.c.l.b16 %v720_v12 }
 0x1ae   : > { %v1412_v38 = vld [vmem:[#allocation2] sm:$0xff]  ;;  %v742_v50 = vsel %vm621_vm4, 0.0, %v734_v22 }
 0x1af   : > { %v1418_v39 = vld [vmem:[#allocation2 + $0x4] sm:$0xff]  ;;  %v1503_v19 = vpop.permute.xlu1 %1502  ;;  %v871_v58 = vpack.c.b16 %v864_v36, %v863_v35  ;;  %1360 = vmatmul.msk.bf16.vlgmr.msrb.gmra.mxu1 %vm880_vm6, %v1412_v38  ;;  %v627_v35 = vrot.slane %v430_v15, 7  ;;  %v626_v36 = vrot.slane %v429_v18, 7  ;;  %v732_v38 = vrot.slane %v616_v25, 7 }
 0x1b0   : > { %v1505_v63 = vunpack.i.h.bf16 %v1503_v19  ;;  %v1504_v2 = vunpack.i.l.bf16 %v1503_v19  ;;  %1386 = vmatmul.msk.bf16.vlgmr.msrb.gmra.mxu2 %vm880_vm6, %v1418_v39  ;;  %v1525_v39 = vunpack.i.h.bf16 %v1523_v14  ;;  %v1524_v19 = vunpack.i.l.bf16 %v1523_v14 }
 0x1b1   : > { %1336 = vmatmul.msk.bf16.vlgmr.msrb.gmra.mxu0 %vm880_vm6, %v871_v58  ;;  %v634_v11 = vsel %vm621_vm4, 0.0, %v626_v36  ;;  %v740_v10 = vsel %vm621_vm4, 0.0, %v732_v38  ;;  %v628_v36 = vrot.slane %v431_v56, 7 }
 0x1b2   : > { %v705_v4 = vsel %vm311_vm1, %v633_v23, %v1505_v63  ;;  %v704_v40 = vsel %vm311_vm1, %v632_v21, %v1504_v2  ;;  %v635_v23 = vsel %vm621_vm4, 0.0, %v627_v35 }
 0x1b3   : > { %v713_v42 = vsel %vm710_vm5, %v704_v40, %v1509_v31  ;;  %v714_v44 = vsel %vm710_vm5, %v705_v4, %v1510_v27  ;;  %v707_v15 = vsel %vm311_vm1, %v635_v23, %v1525_v39  ;;  %v706_v40 = vsel %vm311_vm1, %v634_v11, %v1524_v19 }
 0x1b4   : > { %v721_v47 = vpack.c.bf16 %v713_v42, %v713_v42  ;;  %v722_v48 = vpack.c.bf16 %v714_v44, %v714_v44  ;;  %v1125_v44 = vsel %vm324_vm0, %v1107_v20, 0  ;;  %v636_v49 = vsel %vm621_vm4, 0.0, %v628_v36 }
 0x1b5   : > { %1134 = vmatpush.bf16.msrb.mxu3 %v1125_v44 }
 0x1b6   : > { %v865_v59 = vunpack.c.l.b16 %v721_v47  ;;  %v866_v62 = vunpack.c.l.b16 %v722_v48 }
 0x1b7   : > { %v1498_v0 = vpop.permute.xlu0 %1497 }
 0x1b8   : > { %v1500_v32 = vunpack.i.h.bf16 %v1498_v0  ;;  %v1499_v3 = vunpack.i.l.bf16 %v1498_v0  ;;  %v872_v45 = vpack.c.b16 %v866_v62, %v865_v59  ;;  %v733_v0 = vrot.slane %v617_v60, 7 }
 0x1ba   : > { %v818_v33 = vsel %vm710_vm5, %v810_v6, %v1500_v32  ;;  %v817_v43 = vsel %vm710_vm5, %v809_v28, %v1499_v3 }
 0x1bb   : > { %v826_v8 = vpack.c.bf16 %v818_v33, %v818_v33  ;;  %v825_v12 = vpack.c.bf16 %v817_v43, %v817_v43 }
 0x1bd   : > { %837 = vst.msk [vmem:[#allocation2 + $0x10] sm:$0xf] %vm831_vm3, %v826_v8  ;;  %v741_v8 = vsel %vm621_vm4, 0.0, %v733_v0 }
 0x1be   : > { %836 = vst.msk [vmem:[#allocation2 + $0xc] sm:$0xf] %vm831_vm3, %v825_v12 }
 0x1bf   : > { %v1513_v13 = vpop.permute.xlu0 %1512 }
 0x1c0   : > { %v1515_v58 = vunpack.i.h.bf16 %v1513_v13  ;;  %v1514_v63 = vunpack.i.l.bf16 %v1513_v13 }
 0x1c1   : > { %1337 = vmatmul.msk.bf16.gmra.mxu0 %vm880_vm6, %v872_v45  ;;  %v1538_v45 = vpop.permute.xlu2 %1537 }
 0x1c2   : > { %v812_v41 = vsel %vm311_vm1, %v740_v10, %v1515_v58  ;;  %v811_v42 = vsel %vm311_vm1, %v739_v9, %v1514_v63  ;;  %v1540_v60 = vunpack.i.h.bf16 %v1538_v45  ;;  %v1539_v55 = vunpack.i.l.bf16 %v1538_v45 }
 0x1c5   : > { %v1413_v2 = vld [vmem:[#allocation2 + $0x8] sm:$0xff] }
 0x1c6   : > { %v1419_v21 = vld [vmem:[#allocation2 + $0xc] sm:$0xff]  ;;  %1361 = vmatmul.msk.bf16.gmra.mxu1 %vm880_vm6, %v1413_v2 }
 0x1c7   : > { %v1518_v16 = vpop.permute.xlu1 %1517  ;;  %v1528_v18 = vpop.permute.xlu0 %1527  ;;  %1387 = vmatmul.msk.bf16.gmra.mxu2 %vm880_vm6, %v1419_v21 }
 0x1c8   : > { %v1520_v25 = vunpack.i.h.bf16 %v1518_v16  ;;  %v1519_v27 = vunpack.i.l.bf16 %v1518_v16  ;;  %v1530_v31 = vunpack.i.h.bf16 %v1528_v18  ;;  %v1529_v4 = vunpack.i.l.bf16 %v1528_v18 }
 0x1ca   : > { %v819_v46 = vsel %vm710_vm5, %v811_v42, %v1519_v27  ;;  %v820_v47 = vsel %vm710_vm5, %v812_v41, %v1520_v25  ;;  %v716_v48 = vsel %vm710_vm5, %v707_v15, %v1530_v31  ;;  %v715_v52 = vsel %vm710_vm5, %v706_v40, %v1529_v4 }
 0x1cb   : > { %v827_v57 = vpack.c.bf16 %v819_v46, %v819_v46  ;;  %v828_v59 = vpack.c.bf16 %v820_v47, %v820_v47  ;;  %v723_v62 = vpack.c.bf16 %v715_v52, %v715_v52  ;;  %v724_v53 = vpack.c.bf16 %v716_v48, %v716_v48  ;;  %v1552_v46 = vld [vmem:[%s2147_s4] ss:$0 sm:$0xff] }
 0x1cd   : > { %838 = vst.msk [vmem:[#allocation2 + $0x14] sm:$0xf] %vm831_vm3, %v827_v57  ;;  %v867_v32 = vunpack.c.l.b16 %v723_v62  ;;  %v868_v3 = vunpack.c.l.b16 %v724_v53 }
 0x1ce   : > { %839 = vst.msk [vmem:[#allocation2 + $0x18] sm:$0xf] %vm831_vm3, %v828_v59 }
 0x1cf   : > { %v1533_v6 = vpop.permute.xlu1 %1532  ;;  %v873_v28 = vpack.c.b16 %v868_v3, %v867_v32  ;;  %v1543_v13 = vpop.permute.xlu0 %1542 }
 0x1d0   : > { %v1535_v33 = vunpack.i.h.bf16 %v1533_v6  ;;  %v1534_v43 = vunpack.i.l.bf16 %v1533_v6  ;;  %v1545_v58 = vunpack.i.h.bf16 %v1543_v13  ;;  %v1544_v63 = vunpack.i.l.bf16 %v1543_v13 }
 0x1d1   : > { %1338 = vmatmul.msk.bf16.gmra.mxu0 %vm880_vm6, %v873_v28 }
 0x1d2   : > { %v814_v61 = vsel %vm311_vm1, %v742_v50, %v1535_v33  ;;  %v813_v12 = vsel %vm311_vm1, %v741_v8, %v1534_v43  ;;  %v709_v23 = vsel %vm311_vm1, %v637_v51, %v1545_v58  ;;  %v708_v11 = vsel %vm311_vm1, %v636_v49, %v1544_v63 }
 0x1d3   : > { %v822_v14 = vsel %vm710_vm5, %v814_v61, %v1540_v60  ;;  %v821_v35 = vsel %vm710_vm5, %v813_v12, %v1539_v55 }
 0x1d4   : > { %v830_v38 = vpack.c.bf16 %v822_v14, %v822_v14  ;;  %v829_v39 = vpack.c.bf16 %v821_v35, %v821_v35  ;;  %v1414_v19 = vld [vmem:[#allocation2 + $0x10] sm:$0xff] }
 0x1d5   : > { %v1420_v2 = vld [vmem:[#allocation2 + $0x14] sm:$0xff] }
 0x1d6   : > { %841 = vst.msk [vmem:[#allocation2 + $0x20] sm:$0xf] %vm831_vm3, %v830_v38  ;;  %1362 = vmatmul.msk.bf16.gmra.mxu1 %vm880_vm6, %v1414_v19 }
 0x1d7   : > { %840 = vst.msk [vmem:[#allocation2 + $0x1c] sm:$0xf] %vm831_vm3, %v829_v39  ;;  %v1548_v21 = vpop.permute.xlu1 %1547  ;;  %1388 = vmatmul.msk.bf16.gmra.mxu2 %vm880_vm6, %v1420_v2 }
 0x1d8   : > { %v1550_v54 = vunpack.i.h.bf16 %v1548_v21  ;;  %v1549_v56 = vunpack.i.l.bf16 %v1548_v21 }
 0x1da   : > { %v717_v9 = vsel %vm710_vm5, %v708_v11, %v1549_v56  ;;  %v718_v10 = vsel %vm710_vm5, %v709_v23, %v1550_v54 }
 0x1db   : > { %v725_v15 = vpack.c.bf16 %v717_v9, %v717_v9  ;;  %v726_v16 = vpack.c.bf16 %v718_v10, %v718_v10 }
 0x1dd   : > { %v869_v18 = vunpack.c.l.b16 %v725_v15  ;;  %v870_v20 = vunpack.c.l.b16 %v726_v16 }
 0x1de   : > { %v1415_v27 = vld [vmem:[#allocation2 + $0x18] sm:$0xff] }
 0x1df   : > { %v874_v25 = vpack.c.b16 %v870_v20, %v869_v18  ;;  %v1421_v7 = vld [vmem:[#allocation2 + $0x1c] sm:$0xff] }
 0x1e1   : > { %1339 = vmatmul.msk.bf16.gmra.mxu0 %vm880_vm6, %v874_v25 }
 0x1e6   : > { %1363 = vmatmul.msk.bf16.gmra.mxu1 %vm880_vm6, %v1415_v27 }
 0x1e7   : > { %1389 = vmatmul.msk.bf16.gmra.mxu2 %vm880_vm6, %v1421_v7 }
 0x22c   : > { %v975_v4 = vpop.f32.mrf.mxu1 }
 0x22e   : > { %v906_v31 = vpop.f32.mrf.mxu0 }
 0x22f   : > { %v976_v41 = vadd.f32 %v975_v4, %v906_v31 }
 0x233   : > { %v1055_v40 = vpop.f32.mrf.mxu2 }
 0x234   : > { %v1075_v44 = vadd.f32 %v1055_v40, %v976_v41  ;;  %v977_v47 = vpop.f32.mrf.mxu1 }
 0x236   : > { %v908_v42 = vpop.f32.mrf.mxu0  ;;  %v1087_v57 = vadd.f32 %v1552_v46, %v1075_v44  ;;  %v1553_v44 = vld [vmem:[%s2149_s6] ss:$0 sm:$0xff] }
 0x237   : > { %v978_v48 = vadd.f32 %v977_v47, %v908_v42 }
 0x238   : > { %v1095_v0 = vmax.f32 %v1087_v57, 0.0 }
 0x23b   : > { %v1057_v52 = vpop.f32.mrf.mxu2 }
 0x23c   : > { %v1076_v59 = vadd.f32 %v1057_v52, %v978_v48 }
 0x23e   : > { %v1088_v62 = vadd.f32 %v1552_v46, %v1076_v59  ;;  %v911_v53 = vpop.f32.mrf.mxu0 }
 0x240   : > { %v1096_v22 = vmax.f32 %v1088_v62, 0.0 }
 0x242   : > { %v1103_v32 = vpack.c.bf16 %v1096_v22, %v1095_v0 }
 0x243   : > { %v980_v3 = vpop.f32.mrf.mxu1 }
 0x244   : > { %1390 = vmatmul.msk.bf16.vlgmr.msrb.gmra.mxu3 %vm311_vm1, %v1103_v32  ;;  %v981_v33 = vadd.f32 %v980_v3, %v911_v53 }
 0x246   : > { %v913_v45 = vpop.f32.mrf.mxu0 }
 0x24a   : > { %v1060_v6 = vpop.f32.mrf.mxu2 }
 0x24b   : > { %v982_v28 = vpop.f32.mrf.mxu1  ;;  %v1077_v43 = vadd.f32 %v1060_v6, %v981_v33 }
 0x24c   : > { %v983_v8 = vadd.f32 %v982_v28, %v913_v45 }
 0x24d   : > { %v1089_v55 = vadd.f32 %v1552_v46, %v1077_v43 }
 0x24e   : > { %v916_v50 = vpop.f32.mrf.mxu0 }
 0x24f   : > { %v1097_v14 = vmax.f32 %v1089_v55, 0.0 }
 0x252   : > { %v1062_v60 = vpop.f32.mrf.mxu2 }
 0x253   : > { %v1078_v61 = vadd.f32 %v1062_v60, %v983_v8  ;;  %v985_v12 = vpop.f32.mrf.mxu1 }
 0x254   : > { %v986_v19 = vadd.f32 %v985_v12, %v916_v50 }
 0x255   : > { %v1090_v13 = vadd.f32 %v1552_v46, %v1078_v61 }
 0x256   : > { %v918_v38 = vpop.f32.mrf.mxu0 }
 0x257   : > { %v1098_v35 = vmax.f32 %v1090_v13, 0.0 }
 0x259   : > { %v1104_v36 = vpack.c.bf16 %v1098_v35, %v1097_v14 }
 0x25a   : > { %v1065_v37 = vpop.f32.mrf.mxu2 }
 0x25b   : > { %1391 = vmatmul.msk.bf16.gmra.mxu3 %vm311_vm1, %v1104_v36  ;;  %v987_v39 = vpop.f32.mrf.mxu1  ;;  %v1079_v58 = vadd.f32 %v1065_v37, %v986_v19 }
 0x25c   : > { %v988_v63 = vadd.f32 %v987_v39, %v918_v38 }
 0x25d   : > { %v1091_v21 = vadd.f32 %v1552_v46, %v1079_v58 }
 0x25e   : > { %v921_v56 = vpop.f32.mrf.mxu0 }
 0x25f   : > { %v1099_v23 = vmax.f32 %v1091_v21, 0.0 }
 0x262   : > { %v1067_v2 = vpop.f32.mrf.mxu2 }
 0x263   : > { %v1080_v49 = vadd.f32 %v1067_v2, %v988_v63  ;;  %v990_v51 = vpop.f32.mrf.mxu1 }
 0x264   : > { %v991_v15 = vadd.f32 %v990_v51, %v921_v56 }
 0x265   : > { %v1092_v54 = vadd.f32 %v1552_v46, %v1080_v49 }
 0x266   : > { %v923_v20 = vpop.f32.mrf.mxu0 }
 0x267   : > { %v1100_v11 = vmax.f32 %v1092_v54, 0.0 }
 0x269   : > { %v1105_v9 = vpack.c.bf16 %v1100_v11, %v1099_v23 }
 0x26a   : > { %v1070_v10 = vpop.f32.mrf.mxu2 }
 0x26b   : > { %1392 = vmatmul.msk.bf16.gmra.mxu3 %vm311_vm1, %v1105_v9  ;;  %v992_v16 = vpop.f32.mrf.mxu1  ;;  %v1081_v18 = vadd.f32 %v1070_v10, %v991_v15 }
 0x26c   : > { %v993_v25 = vadd.f32 %v992_v16, %v923_v20 }
 0x26d   : > { %v1093_v7 = vadd.f32 %v1552_v46, %v1081_v18 }
 0x26f   : > { %v1101_v40 = vmax.f32 %v1093_v7, 0.0 }
 0x272   : > { %v1072_v27 = vpop.f32.mrf.mxu2 }
 0x273   : > { %v1082_v31 = vadd.f32 %v1072_v27, %v993_v25 }
 0x275   : > { %v1094_v4 = vadd.f32 %v1552_v46, %v1082_v31 }
 0x277   : > { %v1102_v41 = vmax.f32 %v1094_v4, 0.0 }
 0x279   : > { %v1106_v42 = vpack.c.bf16 %v1102_v41, %v1101_v40 }
 0x27b   : > { %1393 = vmatmul.msk.bf16.gmra.mxu3 %vm311_vm1, %v1106_v42 }
 0x2c7   : > { %v1136_v47 = vpop.f32.mrf.mxu3 }
 0x2c8   : > { %v1137_v48 = vadd.f32 %v1553_v44, %v1136_v47 }
 0x2ca   : > { %v1156_v52 = vadd.f32 %v1137_v48, %v1759_v24 }
 0x2cc   : > { %v1164_v57 = vmax.f32 %v1156_v52, 0.0 }
 0x2ce   : > { %1173 = vst.msk [vmem:[%s2083_s21] sm:$0xff] %vm1172_vm7, %v1164_v57 }
 0x2cf   : > { %v1138_v46 = vpop.f32.mrf.mxu3 }
 0x2d0   : > { %v1139_v59 = vadd.f32 %v1553_v44, %v1138_v46 }
 0x2d2   : > { %v1157_v62 = vadd.f32 %v1139_v59, %v1764_v30 }
 0x2d4   : > { %v1165_v53 = vmax.f32 %v1157_v62, 0.0 }
 0x2d6   : > { %1174 = vst.msk [vmem:[%s2083_s21 + $0x8] sm:$0xff] %vm1172_vm7, %v1165_v53 }
 0x2de   : > { %v1141_v0 = vpop.f32.mrf.mxu3 }
 0x2df   : > { %v1142_v24 = vadd.f32 %v1553_v44, %v1141_v0 }
 0x2e1   : > { %v1158_v22 = vadd.f32 %v1142_v24, %v1799_v1 }
 0x2e3   : > { %v1166_v32 = vmax.f32 %v1158_v22, 0.0 }
 0x2e5   : > { %1175 = vst.msk [vmem:[%s2083_s21 + $0x10] sm:$0xff] %vm1172_vm7, %v1166_v32 }
 0x2e6   : > { %v1143_v3 = vpop.f32.mrf.mxu3 }
 0x2e7   : > { %v1144_v45 = vadd.f32 %v1553_v44, %v1143_v3 }
 0x2e9   : > { %v1159_v6 = vadd.f32 %v1144_v45, %v1808_v5 }
 0x2eb   : > { %v1167_v28 = vmax.f32 %v1159_v6, 0.0 }
 0x2ed   : > { %1176 = vst.msk [vmem:[%s2083_s21 + $0x18] sm:$0xff] %vm1172_vm7, %v1167_v28 }
 0x2ee   : > { %v1146_v30 = vpop.f32.mrf.mxu3 }
 0x2ef   : > { %v1147_v33 = vadd.f32 %v1553_v44, %v1146_v30 }
 0x2f1   : > { %v1160_v43 = vadd.f32 %v1147_v33, %v1836_v29 }
 0x2f3   : > { %v1168_v8 = vmax.f32 %v1160_v43, 0.0 }
 0x2f5   : > { %1177 = vst.msk [vmem:[%s2083_s21 + $0x20] sm:$0xff] %vm1172_vm7, %v1168_v8 }
 0x2f6   : > { %v1148_v1 = vpop.f32.mrf.mxu3 }
 0x2f7   : > { %v1149_v50 = vadd.f32 %v1553_v44, %v1148_v1 }
 0x2f9   : > { %v1161_v60 = vadd.f32 %v1149_v50, %v1842_v34 }
 0x2fb   : > { %v1169_v55 = vmax.f32 %v1161_v60, 0.0 }
 0x2fd   : > { %1178 = vst.msk [vmem:[%s2083_s21 + $0x28] sm:$0xff] %vm1172_vm7, %v1169_v55 }
 0x2fe   : > { %v1151_v5 = vpop.f32.mrf.mxu3 }
 0x2ff   : > { %v1152_v61 = vadd.f32 %v1553_v44, %v1151_v5 }
 0x301   : > { %v1162_v12 = vadd.f32 %v1152_v61, %v1895_v17 }
 0x303   : > { %v1170_v13 = vmax.f32 %v1162_v12, 0.0 }
 0x305   : > { %1179 = vst.msk [vmem:[%s2083_s21 + $0x30] sm:$0xff] %vm1172_vm7, %v1170_v13 }
 0x306   : > { %v1153_v29 = vpop.f32.mrf.mxu3 }
 0x307   : > { %v1154_v34 = vadd.f32 %v1553_v44, %v1153_v29 }
 0x309   : > { %v1163_v14 = vadd.f32 %v1154_v34, %v1901_v26 }
 0x30b   : > { %v1171_v35 = vmax.f32 %v1163_v14, 0.0 }
 0x30d   : > { %1180 = vst.msk [vmem:[%s2083_s21 + $0x38] sm:$0xff] %vm1172_vm7, %v1171_v35 }
 0x30e   : > { %1581 = shalt.err (!%p1578_p3)
}
 0x30f   : > { %s1625_s19 = smov 128  }
 0x310   : > { %1424 = dma.vmem_to_hbm [thread:$0]  (%p1704_p5), %s1195_s22, 1024, %s1197_s9, %s1182_s28, %s1625_s19, %s1625_s19, %s1623_s13  }
 0x311 PF: > { %p1430_p4 = scmp.ge.s32.totalorder %s1616_s27, 2  ;;  %s1211_s21 = sand.u32 1, %s1604_s24  }
 0x312   : > { %s1212_s8 = scalar_lea.sflag [#allocation4], %s1211_s21 }
 0x313   : > { %p1427_p7 = pnand %p1430_p4, %p1708_p6 }
 0x315   : > { %p1428_p8 = pneg %p1427_p7 }
 0x317   : > { %1599 = dma.done.wait (%p1428_p8), %s1212_s8, 1024  }
 0x318   : > { %1601 = vsyncadd (%p1428_p8), %s1212_s8, 4294966272  ;;  %p17_p9 = scmp.ge.s32.totalorder %s1691_s30, 4   ;;  %s2153_s24 = smov %s1608_s25 }
 0x319   : > { %s2154_s25 = smov %s1612_s26  ;;  %s2155_s26 = smov %s1702_s10 }
 0x31a   : > { %s2156_s27 = smov %s1691_s30  ;;  %19 = sbr.rel (!%p17_p9) target bundleno = 3 (0x3), region = 86 }
 0x31f   :  { %1218 = vsyncpa [#allocation4], 1 }
 0x320   :  { %1220 = vsyncpa [#allocation4 + $0x1], 1 }

</bundles_post_ra>
